<compile_context>
chip_gen: v7x
topology: tpu7x:2x2x1
jax: 0.10.0
libtpu: 0.0.40
codegen_flags: <defaults>
</compile_context>

<pallas_src>
import math

import jax
import jax.numpy as jnp
from jax.experimental import pallas as pl
from jax.experimental.pallas import tpu as pltpu


def fcn_kernel(x_ref, w1_ref, b1_ref, w2_ref, b2_ref, w3_ref, b3_ref, o_ref):
    # x_ref : [42, TILE_B] bf16   (features x batch; batch on the lane axis)
    # w*_ref: [out, in]    bf16   (PyTorch weight layout, so W @ x directly)
    # b*_ref: [out, 1]     f32
    # o_ref : [3, TILE_B]  f32    (lane-dense store)

    # Layer 1: Linear(42 -> 256) + ReLU   (bf16 MXU, f32 accumulate)
    h1 = jnp.dot(w1_ref[...], x_ref[...], preferred_element_type=jnp.float32)
    h1 = jnp.maximum(h1 + b1_ref[...], 0.0)

    # Layer 2: Linear(256 -> 128) + ReLU
    h2 = jnp.dot(w2_ref[...], h1.astype(w2_ref.dtype),
                 preferred_element_type=jnp.float32)
    h2 = jnp.maximum(h2 + b2_ref[...], 0.0)

    # Layer 3: Linear(128 -> 3)
    logits = jnp.dot(w3_ref[...], h2.astype(w3_ref.dtype),
                     preferred_element_type=jnp.float32)
    logits = logits + b3_ref[...]

    # log_softmax over the class axis (axis 0 in this transposed layout),
    # numerically stable, all in f32.
    m = jnp.max(logits, axis=0, keepdims=True)
    shifted = logits - m
    lse = jnp.log(jnp.sum(jnp.exp(shifted), axis=0, keepdims=True))
    o_ref[...] = shifted - lse


def fcn_forward(x, params, tile_b=512):
    """x: [B, 42] float32. Returns log_softmax(logits) as [B, 3] float32."""
    w1, b1, w2, b2, w3, b3 = params  # W: [out, in], b: [out, 1]
    B = x.shape[0]

    # Batch lives on the 128-wide lane axis inside the kernel, so the tile
    # must be a multiple of 128; don't over-pad tiny batches.
    tile_b = max(128, min(tile_b, pl.cdiv(B, 128) * 128))
    B_pad = pl.cdiv(B, tile_b) * tile_b
    n_tiles = B_pad // tile_b

    # Transposed, zero-padded, bf16 activations (layout plumbing only).
    xT = x.T.astype(jnp.bfloat16)
    if B_pad != B:
        xT = jnp.pad(xT, ((0, 0), (0, B_pad - B)))

    w1b = w1.astype(jnp.bfloat16)
    w2b = w2.astype(jnp.bfloat16)
    w3b = w3.astype(jnp.bfloat16)

    flops = 2 * B_pad * (42 * 256 + 256 * 128 + 128 * 3)
    bytes_accessed = (
        xT.size * 2
        + (w1b.size + w2b.size + w3b.size) * 2
        + (b1.size + b2.size + b3.size) * 4
        + 3 * B_pad * 4)

    def resident(shape):
        # Constant block index -> operand stays VMEM-resident across the grid.
        return pl.BlockSpec(shape, lambda i: (0, 0))

    outT = pl.pallas_call(
        fcn_kernel,
        out_shape=jax.ShapeDtypeStruct((3, B_pad), jnp.float32),
        grid=(n_tiles,),
        in_specs=[
            pl.BlockSpec((42, tile_b), lambda i: (0, i)),   # x (tiled)
            resident((256, 42)), resident((256, 1)),        # W1, b1
            resident((128, 256)), resident((128, 1)),       # W2, b2
            resident((3, 128)), resident((3, 1)),           # W3, b3
        ],
        out_specs=pl.BlockSpec((3, tile_b), lambda i: (0, i)),
        compiler_params=pltpu.CompilerParams(
            dimension_semantics=("parallel",)),
        cost_estimate=pl.CostEstimate(
            flops=flops,
            transcendentals=4 * B_pad,
            bytes_accessed=bytes_accessed),
    )(xT, w1b, b1, w2b, b2, w3b, b3)

    return outT[:, :B].T  # back to [B, 3] f32


def init_params(key):
    """Deterministic init mimicking PyTorch nn.Linear defaults:
    U(-1/sqrt(fan_in), 1/sqrt(fan_in)); weights kept in PyTorch [out, in]
    layout, biases as [out, 1] columns (TPU-friendly 2-D)."""
    dims = [(42, 256), (256, 128), (128, 3)]
    params = []
    for fan_in, fan_out in dims:
        key, kw, kb = jax.random.split(key, 3)
        bound = 1.0 / math.sqrt(fan_in)
        w = jax.random.uniform(kw, (fan_out, fan_in), jnp.float32, -bound, bound)
        b = jax.random.uniform(kb, (fan_out, 1), jnp.float32, -bound, bound)
        params += [w, b]
    return tuple(params)


def reference_forward(x, params, mxu_dtype=jnp.float32):
    """Plain-JAX reference. mxu_dtype=bf16 mirrors the kernel's mixed
    precision (bf16 matmul inputs, f32 accumulation, f32 elementwise)."""
    w1, b1, w2, b2, w3, b3 = params

    def lin(h, w, b):
        return jnp.dot(h.astype(mxu_dtype), w.T.astype(mxu_dtype),
                       preferred_element_type=jnp.float32) + b[:, 0]

    h1 = jnp.maximum(lin(x, w1, b1), 0.0)
    h2 = jnp.maximum(lin(h1, w2, b2), 0.0)
    logits = lin(h2, w3, b3)
    return jax.nn.log_softmax(logits, axis=-1)


if __name__ == "__main__":
    key = jax.random.PRNGKey(0)
    kx, kp, kx2 = jax.random.split(key, 3)

    params = init_params(kp)

    # Small batch (single tile; 8 rows padded up to one 128-wide lane tile).
    x_small = jax.random.normal(kx, (8, 42), jnp.float32)
    out_small = jax.block_until_ready(fcn_forward(x_small, params))
    assert out_small.shape == (8, 3)
    ref_mixed = reference_forward(x_small, params, mxu_dtype=jnp.bfloat16)
    ref_f32 = reference_forward(x_small, params, mxu_dtype=jnp.float32)
    assert jnp.allclose(out_small, ref_mixed, atol=1e-3, rtol=1e-3)
    assert jnp.allclose(out_small, ref_f32, atol=1e-1, rtol=1e-1)

    # Ragged batch spanning multiple grid steps (1030 -> 3 tiles of 512).
    x_big = jax.random.normal(kx2, (1030, 42), jnp.float32)
    out_big = jax.block_until_ready(fcn_forward(x_big, params))
    assert out_big.shape == (1030, 3)
    ref_big = reference_forward(x_big, params, mxu_dtype=jnp.bfloat16)
    assert jnp.allclose(out_big, ref_big, atol=1e-3, rtol=1e-3)

    print("KERNEL_OK")
</pallas_src>

<mosaic_0001>
module attributes {stable_mosaic.version = 11 : i64} {
  func.func @fcn_kernel(%arg0: i32, %arg1: memref<42x128xbf16, #tpu.memory_space<vmem>>, %arg2: memref<256x42xbf16, #tpu.memory_space<vmem>>, %arg3: memref<256x1xf32, #tpu.memory_space<vmem>>, %arg4: memref<128x256xbf16, #tpu.memory_space<vmem>>, %arg5: memref<128x1xf32, #tpu.memory_space<vmem>>, %arg6: memref<3x128xbf16, #tpu.memory_space<vmem>>, %arg7: memref<3x1xf32, #tpu.memory_space<vmem>>, %arg8: memref<3x128xf32, #tpu.memory_space<vmem>>) attributes {dimension_semantics = [#tpu.dimension_semantics<parallel>], iteration_bounds = array<i64: 1>, scalar_prefetch = 0 : i64, scratch_operands = 0 : i64, tpu.core_type = #tpu.core_type<tc>, window_params = [{transform_indices = @transform_0, window_bounds = array<i64: 42, 128>}, {pipeline_mode = #tpu.pipeline_mode<synchronous>, transform_indices = @transform_1, window_bounds = array<i64: 256, 42>}, {pipeline_mode = #tpu.pipeline_mode<synchronous>, transform_indices = @transform_2, window_bounds = array<i64: 256, 1>}, {pipeline_mode = #tpu.pipeline_mode<synchronous>, transform_indices = @transform_3, window_bounds = array<i64: 128, 256>}, {pipeline_mode = #tpu.pipeline_mode<synchronous>, transform_indices = @transform_4, window_bounds = array<i64: 128, 1>}, {pipeline_mode = #tpu.pipeline_mode<synchronous>, transform_indices = @transform_5, window_bounds = array<i64: 3, 128>}, {pipeline_mode = #tpu.pipeline_mode<synchronous>, transform_indices = @transform_6, window_bounds = array<i64: 3, 1>}, {transform_indices = @transform_7, window_bounds = array<i64: 3, 128>}]} {
    %c0 = arith.constant 0 : index
    %c0_0 = arith.constant 0 : index
    %0 = vector.load %arg2[%c0, %c0_0] : memref<256x42xbf16, #tpu.memory_space<vmem>>, vector<256x42xbf16>
    %c0_1 = arith.constant 0 : index
    %c0_2 = arith.constant 0 : index
    %1 = vector.load %arg1[%c0_1, %c0_2] : memref<42x128xbf16, #tpu.memory_space<vmem>>, vector<42x128xbf16>
    %cst = arith.constant dense<0.000000e+00> : vector<256x128xf32>
    %2 = tpu.matmul %0, %1, %cst {dimension_numbers = #tpu.dot_dimension_numbers<[1], [0], [0], [1], [0, 0, 1, 1], [], []>} : vector<256x42xbf16>, vector<42x128xbf16>, vector<256x128xf32> -> vector<256x128xf32>
    %c0_3 = arith.constant 0 : index
    %c0_4 = arith.constant 0 : index
    %3 = vector.load %arg3[%c0_3, %c0_4] : memref<256x1xf32, #tpu.memory_space<vmem>>, vector<256x1xf32>
    %4 = vector.broadcast %3 : vector<256x1xf32> to vector<256x128xf32>
    %5 = arith.addf %2, %4 : vector<256x128xf32>
    %cst_5 = arith.constant 0.000000e+00 : f32
    %6 = vector.broadcast %cst_5 : f32 to vector<256x128xf32>
    %7 = arith.maximumf %5, %6 : vector<256x128xf32>
    %c0_6 = arith.constant 0 : index
    %c0_7 = arith.constant 0 : index
    %8 = vector.load %arg4[%c0_6, %c0_7] : memref<128x256xbf16, #tpu.memory_space<vmem>>, vector<128x256xbf16>
    %9 = arith.truncf %7 : vector<256x128xf32> to vector<256x128xbf16>
    %cst_8 = arith.constant dense<0.000000e+00> : vector<128x128xf32>
    %10 = tpu.matmul %8, %9, %cst_8 {dimension_numbers = #tpu.dot_dimension_numbers<[1], [0], [0], [1], [0, 0, 1, 1], [], []>} : vector<128x256xbf16>, vector<256x128xbf16>, vector<128x128xf32> -> vector<128x128xf32>
    %c0_9 = arith.constant 0 : index
    %c0_10 = arith.constant 0 : index
    %11 = vector.load %arg5[%c0_9, %c0_10] : memref<128x1xf32, #tpu.memory_space<vmem>>, vector<128x1xf32>
    %12 = vector.broadcast %11 : vector<128x1xf32> to vector<128x128xf32>
    %13 = arith.addf %10, %12 : vector<128x128xf32>
    %cst_11 = arith.constant 0.000000e+00 : f32
    %14 = vector.broadcast %cst_11 : f32 to vector<128x128xf32>
    %15 = arith.maximumf %13, %14 : vector<128x128xf32>
    %c0_12 = arith.constant 0 : index
    %c0_13 = arith.constant 0 : index
    %16 = vector.load %arg6[%c0_12, %c0_13] : memref<3x128xbf16, #tpu.memory_space<vmem>>, vector<3x128xbf16>
    %17 = arith.truncf %15 : vector<128x128xf32> to vector<128x128xbf16>
    %cst_14 = arith.constant dense<0.000000e+00> : vector<3x128xf32>
    %18 = tpu.matmul %16, %17, %cst_14 {dimension_numbers = #tpu.dot_dimension_numbers<[1], [0], [0], [1], [0, 0, 1, 1], [], []>} : vector<3x128xbf16>, vector<128x128xbf16>, vector<3x128xf32> -> vector<3x128xf32>
    %c0_15 = arith.constant 0 : index
    %c0_16 = arith.constant 0 : index
    %19 = vector.load %arg7[%c0_15, %c0_16] : memref<3x1xf32, #tpu.memory_space<vmem>>, vector<3x1xf32>
    %20 = vector.broadcast %19 : vector<3x1xf32> to vector<3x128xf32>
    %21 = arith.addf %18, %20 : vector<3x128xf32>
    %cst_17 = arith.constant dense<0xFF800000> : vector<128xf32>
    %22 = vector.multi_reduction <maximumf>, %21, %cst_17 [0] : vector<3x128xf32> to vector<128xf32>
    %23 = vector.shape_cast %22 : vector<128xf32> to vector<1x128xf32>
    %24 = vector.broadcast %23 : vector<1x128xf32> to vector<3x128xf32>
    %25 = arith.subf %21, %24 : vector<3x128xf32>
    %26 = math.exp %25 : vector<3x128xf32>
    %cst_18 = arith.constant dense<0.000000e+00> : vector<128xf32>
    %27 = vector.multi_reduction <add>, %26, %cst_18 [0] : vector<3x128xf32> to vector<128xf32>
    %28 = vector.shape_cast %27 : vector<128xf32> to vector<1x128xf32>
    %29 = math.log %28 : vector<1x128xf32>
    %30 = vector.broadcast %29 : vector<1x128xf32> to vector<3x128xf32>
    %31 = arith.subf %25, %30 : vector<3x128xf32>
    %c0_19 = arith.constant 0 : index
    %c0_20 = arith.constant 0 : index
    %32 = vector.load %arg8[%c0_19, %c0_20] : memref<3x128xf32, #tpu.memory_space<vmem>>, vector<3x128xf32>
    tpu.vector_store %arg8[%c0_19, %c0_20], %31 {strides = array<i32>} : memref<3x128xf32, #tpu.memory_space<vmem>>, vector<3x128xf32>,
    return
  }
  func.func @transform_0(%arg0: i32) -> (i32, i32) {
    %c0_i32 = arith.constant 0 : i32
    %c0_i32_0 = arith.constant 0 : i32
    return %c0_i32, %arg0 : i32, i32
  }
  func.func @transform_1(%arg0: i32) -> (i32, i32) {
    %c0_i32 = arith.constant 0 : i32
    %c0_i32_0 = arith.constant 0 : i32
    %c0_i32_1 = arith.constant 0 : i32
    return %c0_i32, %c0_i32_0 : i32, i32
  }
  func.func @transform_2(%arg0: i32) -> (i32, i32) {
    %c0_i32 = arith.constant 0 : i32
    %c0_i32_0 = arith.constant 0 : i32
    %c0_i32_1 = arith.constant 0 : i32
    return %c0_i32, %c0_i32_0 : i32, i32
  }
  func.func @transform_3(%arg0: i32) -> (i32, i32) {
    %c0_i32 = arith.constant 0 : i32
    %c0_i32_0 = arith.constant 0 : i32
    %c0_i32_1 = arith.constant 0 : i32
    return %c0_i32, %c0_i32_0 : i32, i32
  }
  func.func @transform_4(%arg0: i32) -> (i32, i32) {
    %c0_i32 = arith.constant 0 : i32
    %c0_i32_0 = arith.constant 0 : i32
    %c0_i32_1 = arith.constant 0 : i32
    return %c0_i32, %c0_i32_0 : i32, i32
  }
  func.func @transform_5(%arg0: i32) -> (i32, i32) {
    %c0_i32 = arith.constant 0 : i32
    %c0_i32_0 = arith.constant 0 : i32
    %c0_i32_1 = arith.constant 0 : i32
    return %c0_i32, %c0_i32_0 : i32, i32
  }
  func.func @transform_6(%arg0: i32) -> (i32, i32) {
    %c0_i32 = arith.constant 0 : i32
    %c0_i32_0 = arith.constant 0 : i32
    %c0_i32_1 = arith.constant 0 : i32
    return %c0_i32, %c0_i32_0 : i32, i32
  }
  func.func @transform_7(%arg0: i32) -> (i32, i32) {
    %c0_i32 = arith.constant 0 : i32
    %c0_i32_0 = arith.constant 0 : i32
    return %c0_i32, %arg0 : i32, i32
  }
}

</mosaic_0001>

<bundles_post_ra>
// kernel: tpu_custom_call.1
= control target key start
LH: loop header
LB: loop body
LE: loop exit
PB: predicated region body
PF: predicated region fallthrough
CT: control target
= control target key end

     0   :  { %v1292_v1 = vmov 0   ;;  %vm355_vm0 = vcmask 343040   ;;  %vm404_vm1 = vcmask 1044480   ;;  %s1702_s0 = inlined_call_operand.vmem [shape: bf16[42,128], index: 0, kind: input, shape index: {}]   ;;  %s1703_s1 = inlined_call_operand.vmem [shape: bf16[256,42], index: 1, kind: input, shape index: {}]   ;;  %s1704_s2 = inlined_call_operand.vmem [shape: f32[256,1], index: 2, kind: input, shape index: {}]   ;;  %s1705_s3 = inlined_call_operand.vmem [shape: bf16[128,256], index: 3, kind: input, shape index: {}]   ;;  %s1706_s4 = inlined_call_operand.vmem [shape: f32[128,1], index: 4, kind: input, shape index: {}]   ;;  %s1707_s5 = inlined_call_operand.vmem [shape: bf16[3,128], index: 5, kind: input, shape index: {}]   ;;  %s1708_s6 = inlined_call_operand.vmem [shape: f32[3,1], index: 6, kind: input, shape index: {}]   ;;  %s1709_s7 = inlined_call_operand.hbm [shape: f32[3,128], index: 7, kind: output, shape index: {}]  }
   0x1   :  { %v1221_v0 = vld [vmem:[%s1702_s0] sm:$0xff]   ;;  %1219 = vset.pattern.permute.xlu0 %v1292_v1  ;;  %1220 = vset.pattern.permute.xlu1 %v1292_v1  ;;  %v1222_v3 = vld [vmem:[%s1702_s0 + $0x8] sm:$0xff]   ;;  %v1223_v6 = vld [vmem:[%s1702_s0 + $0x10] sm:$0x1f]  }
   0x2   :  { %v82_v2 = vld [vmem:[%s1704_s2 + $0x80] sm:$0xff]  ;;  %1156 = vmatprep.subr.bf16.mxu0 %v1221_v0  ;;  %v83_v4 = vld [vmem:[%s1704_s2 + $0x88] sm:$0xff]  ;;  %v84_v9 = vld [vmem:[%s1704_s2 + $0x90] sm:$0xff]  ;;  %v406_v10 = vsel %vm404_vm1, %v1223_v6, 0 }
   0x3   :  { %180 = vperm.xlu0 %1219, %v82_v2   ;;  %v66_v5 = vld [vmem:[%s1704_s2] sm:$0xff]  ;;  %1157 = vmatpush3.bf16.msra.mxu0 %v1221_v0  ;;  %v67_v8 = vld [vmem:[%s1704_s2 + $0x8] sm:$0xff]  ;;  %v85_v11 = vld [vmem:[%s1704_s2 + $0x98] sm:$0xff] }
   0x4   :  { %100 = vperm.xlu1 %1220, %v66_v5   ;;  %1158 = vmatprep.subr.bf16.mxu0 %v1222_v3  ;;  %v1224_v7 = vld [vmem:[%s1703_s1] sm:$0xff]   ;;  %v1225_v12 = vld [vmem:[%s1703_s1 + $0x8] sm:$0xff]   ;;  %v68_v13 = vld [vmem:[%s1704_s2 + $0x10] sm:$0xff] }
   0x5   :  { %1162 = vmatprep.mubr.msk.bf16.mxu0 %vm355_vm0, %v1224_v7  ;;  %v1226_v14 = vld [vmem:[%s1703_s1 + $0x10] sm:$0xff]   ;;  %v69_v15 = vld [vmem:[%s1704_s2 + $0x18] sm:$0xff]  ;;  %v86_v16 = vld [vmem:[%s1704_s2 + $0xa0] sm:$0xff] }
   0x6   :  { %v87_v17 = vld [vmem:[%s1704_s2 + $0xa8] sm:$0xff]  ;;  %v1227_v18 = vld [vmem:[%s1703_s1 + $0x18] sm:$0xff]   ;;  %v70_v19 = vld [vmem:[%s1704_s2 + $0x20] sm:$0xff] }
   0x7   :  { %185 = vperm.xlu0 %1219, %v83_v4   ;;  %1159 = vmatpush3.bf16.msra.mxu0 %v1222_v3  ;;  %v1228_v20 = vld [vmem:[%s1703_s1 + $0x20] sm:$0xff]   ;;  %v71_v21 = vld [vmem:[%s1704_s2 + $0x28] sm:$0xff]  ;;  %v88_v22 = vld [vmem:[%s1704_s2 + $0xb0] sm:$0xff] }
   0x8   :  { %105 = vperm.xlu1 %1220, %v67_v8   ;;  %1214 = vmatprep.subr.msk.bf16.mxu0 %vm404_vm1, %v1223_v6  ;;  %v89_v23 = vld [vmem:[%s1704_s2 + $0xb8] sm:$0xff]  ;;  %v1229_v24 = vld [vmem:[%s1703_s1 + $0x28] sm:$0xff]   ;;  %v72_v25 = vld [vmem:[%s1704_s2 + $0x30] sm:$0xff] }
   0x9   :  { %v1230_v26 = vld [vmem:[%s1703_s1 + $0x30] sm:$0xff]   ;;  %v73_v27 = vld [vmem:[%s1704_s2 + $0x38] sm:$0xff]  ;;  %v90_v28 = vld [vmem:[%s1704_s2 + $0xc0] sm:$0xff] }
   0xa   :  { %v91_v29 = vld [vmem:[%s1704_s2 + $0xc8] sm:$0xff]  ;;  %v1231_v30 = vld [vmem:[%s1703_s1 + $0x38] sm:$0xff]   ;;  %v74_v31 = vld [vmem:[%s1704_s2 + $0x40] sm:$0xff] }
   0xb   :  { %190 = vperm.xlu0 %1219, %v84_v9   ;;  %1161 = vmatpush3.bf16.msra.mxu0 %v406_v10  ;;  %v1232_v32 = vld [vmem:[%s1703_s1 + $0x40] sm:$0xff]   ;;  %v75_v33 = vld [vmem:[%s1704_s2 + $0x48] sm:$0xff]  ;;  %v92_v34 = vld [vmem:[%s1704_s2 + $0xd0] sm:$0xff] }
   0xc   :  { %195 = vperm.xlu1 %1220, %v85_v11   ;;  %v93_v35 = vld [vmem:[%s1704_s2 + $0xd8] sm:$0xff] }
   0xe   :  { %1163 = vmatmul.mubr.msk.bf16.vlgmr.msra.gmra.mrb[0].mxu0 %vm355_vm0, %v1225_v12 }
   0xf   :  { %110 = vperm.xlu0 %1219, %v68_v13   ;;  %1166 = vmatprep.mubr.msk.bf16.mxu0 %vm355_vm0, %v1226_v14 }
  0x10   :  { %115 = vperm.xlu1 %1220, %v69_v15  }
  0x13   :  { %200 = vperm.xlu0 %1219, %v86_v16  }
  0x14   :  { %205 = vperm.xlu1 %1220, %v87_v17  }
  0x16   :  { %1167 = vmatmul.mubr.msk.bf16.gmra.mrb[4].mxu0 %vm355_vm0, %v1227_v18 }
  0x17   :  { %120 = vperm.xlu0 %1219, %v70_v19   ;;  %1170 = vmatprep.mubr.msk.bf16.mxu0 %vm355_vm0, %v1228_v20 }
  0x18   :  { %125 = vperm.xlu1 %1220, %v71_v21  }
  0x1b   :  { %210 = vperm.xlu0 %1219, %v88_v22  }
  0x1c   :  { %215 = vperm.xlu1 %1220, %v89_v23  }
  0x1e   :  { %1171 = vmatmul.mubr.msk.bf16.gmra.mrb[8].mxu0 %vm355_vm0, %v1229_v24 }
  0x1f   :  { %130 = vperm.xlu0 %1219, %v72_v25   ;;  %1174 = vmatprep.mubr.msk.bf16.mxu0 %vm355_vm0, %v1230_v26 }
  0x20   :  { %135 = vperm.xlu1 %1220, %v73_v27  }
  0x23   :  { %220 = vperm.xlu0 %1219, %v90_v28  }
  0x24   :  { %225 = vperm.xlu1 %1220, %v91_v29  }
  0x26   :  { %1175 = vmatmul.mubr.msk.bf16.gmra.mrb[12].mxu0 %vm355_vm0, %v1231_v30 }
  0x27   :  { %140 = vperm.xlu0 %1219, %v74_v31   ;;  %1178 = vmatprep.mubr.msk.bf16.mxu0 %vm355_vm0, %v1232_v32 }
  0x28   :  { %145 = vperm.xlu1 %1220, %v75_v33  }
  0x29   :  { %12 = vsyncpa [#allocation3], 0  ;;  %v1233_v36 = vld [vmem:[%s1703_s1 + $0x48] sm:$0xff]   ;;  %v76_v37 = vld [vmem:[%s1704_s2 + $0x50] sm:$0xff]  ;;  %vm1294_vm2 = vmmov 0   ;;  %vm977_vm3 = vcmask 1042432  }
  0x2a   :  { %v1234_v38 = vld [vmem:[%s1703_s1 + $0x50] sm:$0xff]   ;;  %v77_v39 = vld [vmem:[%s1704_s2 + $0x58] sm:$0xff]  ;;  %v94_v40 = vld [vmem:[%s1704_s2 + $0xe0] sm:$0xff] }
  0x2b   :  { %230 = vperm.xlu0 %1219, %v92_v34   ;;  %v95_v41 = vld [vmem:[%s1704_s2 + $0xe8] sm:$0xff]  ;;  %v1235_v42 = vld [vmem:[%s1703_s1 + $0x58] sm:$0xff]   ;;  %v78_v43 = vld [vmem:[%s1704_s2 + $0x60] sm:$0xff] }
  0x2c   :  { %235 = vperm.xlu1 %1220, %v93_v35   ;;  %v1236_v44 = vld [vmem:[%s1703_s1 + $0x60] sm:$0xff]   ;;  %v79_v45 = vld [vmem:[%s1704_s2 + $0x68] sm:$0xff]  ;;  %v96_v46 = vld [vmem:[%s1704_s2 + $0xf0] sm:$0xff] }
  0x2d   :  { %v97_v47 = vld [vmem:[%s1704_s2 + $0xf8] sm:$0xff]  ;;  %v1237_v48 = vld [vmem:[%s1703_s1 + $0x68] sm:$0xff]   ;;  %v80_v49 = vld [vmem:[%s1704_s2 + $0x70] sm:$0xff] }
  0x2e   :  { %1179 = vmatmul.mubr.msk.bf16.gmra.mrb[16].mxu0 %vm355_vm0, %v1233_v36  ;;  %v1238_v50 = vld [vmem:[%s1703_s1 + $0x70] sm:$0xff]   ;;  %v81_v51 = vld [vmem:[%s1704_s2 + $0x78] sm:$0xff]  ;;  %v633_v52 = vld [vmem:[%s1706_s4] sm:$0xff] }
  0x2f   :  { %150 = vperm.xlu0 %1219, %v76_v37   ;;  %1182 = vmatprep.mubr.msk.bf16.mxu0 %vm355_vm0, %v1234_v38  ;;  %v634_v53 = vld [vmem:[%s1706_s4 + $0x8] sm:$0xff]  ;;  %v1239_v54 = vld [vmem:[%s1703_s1 + $0x78] sm:$0xff]   ;;  %v635_v55 = vld [vmem:[%s1706_s4 + $0x10] sm:$0xff] }
  0x30   :  { %155 = vperm.xlu1 %1220, %v77_v39   ;;  %v636_v56 = vld [vmem:[%s1706_s4 + $0x18] sm:$0xff]  ;;  %v637_v57 = vld [vmem:[%s1706_s4 + $0x20] sm:$0xff]  ;;  %v638_v58 = vld [vmem:[%s1706_s4 + $0x28] sm:$0xff] }
  0x31   :  { %v639_v59 = vld [vmem:[%s1706_s4 + $0x30] sm:$0xff]  ;;  %v640_v60 = vld [vmem:[%s1706_s4 + $0x38] sm:$0xff]  ;;  %v641_v61 = vld [vmem:[%s1706_s4 + $0x40] sm:$0xff] }
  0x32   :  { %v642_v62 = vld [vmem:[%s1706_s4 + $0x48] sm:$0xff]  ;;  %v643_v63 = vld [vmem:[%s1706_s4 + $0x50] sm:$0xff]  ;;  %v644_v0 = vld [vmem:[%s1706_s4 + $0x58] sm:$0xff] }
  0x33   :  { %240 = vperm.xlu0 %1219, %v94_v40   ;;  %v645_v1 = vld [vmem:[%s1706_s4 + $0x60] sm:$0xff]  ;;  %v646_v2 = vld [vmem:[%s1706_s4 + $0x68] sm:$0xff]  ;;  %v647_v3 = vld [vmem:[%s1706_s4 + $0x70] sm:$0xff] }
  0x34   :  { %245 = vperm.xlu1 %1220, %v95_v41   ;;  %v648_v4 = vld [vmem:[%s1706_s4 + $0x78] sm:$0xff]  ;;  %v931_v5 = vld [vmem:[%s1708_s6] sm:$0x7]  ;;  %v1242_v10 = vld [vmem:[%s1705_s3 + $0x4] ss:$8 sps:$4 sm:$0xff]  }
  0x35   :  { %841 = vmatprep.mubr.bf16.mxu1 %v1242_v10 }
  0x36   :  { %1183 = vmatmul.mubr.msk.bf16.gmra.mrb[20].mxu0 %vm355_vm0, %v1235_v42 }
  0x37   :  { %160 = vperm.xlu0 %1219, %v78_v43   ;;  %1186 = vmatprep.mubr.msk.bf16.mxu0 %vm355_vm0, %v1236_v44 }
  0x38   :  { %165 = vperm.xlu1 %1220, %v79_v45  }
  0x3b   :  { %250 = vperm.xlu0 %1219, %v96_v46  }
  0x3c   :  { %255 = vperm.xlu1 %1220, %v97_v47  }
  0x3e   :  { %1187 = vmatmul.mubr.msk.bf16.gmra.mrb[24].mxu0 %vm355_vm0, %v1237_v48 }
  0x3f   :  { %170 = vperm.xlu0 %1219, %v80_v49   ;;  %1190 = vmatprep.mubr.msk.bf16.mxu0 %vm355_vm0, %v1238_v50 }
  0x40   :  { %175 = vperm.xlu1 %1220, %v81_v51  }
  0x43   :  { %651 = vperm.xlu0 %1219, %v633_v52  }
  0x44   :  { %656 = vperm.xlu1 %1220, %v634_v53  }
  0x46   :  { %1191 = vmatmul.mubr.msk.bf16.gmra.mrb[28].mxu0 %vm355_vm0, %v1239_v54 }
  0x47   :  { %661 = vperm.xlu0 %1219, %v635_v55  }
  0x48   :  { %666 = vperm.xlu1 %1220, %v636_v56  }
  0x4b   :  { %671 = vperm.xlu0 %1219, %v637_v57  }
  0x4c   :  { %676 = vperm.xlu1 %1220, %v638_v58  }
  0x4f   :  { %681 = vperm.xlu0 %1219, %v639_v59  }
  0x50   :  { %686 = vperm.xlu1 %1220, %v640_v60  }
  0x53   :  { %691 = vperm.xlu0 %1219, %v641_v61  }
  0x54   :  { %696 = vperm.xlu1 %1220, %v642_v62  }
  0x57   :  { %701 = vperm.xlu0 %1219, %v643_v63  }
  0x58   :  { %706 = vperm.xlu1 %1220, %v644_v0  }
  0x5b   :  { %711 = vperm.xlu0 %1219, %v645_v1  }
  0x5c   :  { %716 = vperm.xlu1 %1220, %v646_v2  }
  0x5f   :  { %721 = vperm.xlu0 %1219, %v647_v3  }
  0x60   :  { %726 = vperm.xlu1 %1220, %v648_v4  }
  0x63   :  { %934 = vperm.xlu0 %1219, %v931_v5  }
  0x82   :  { %v1556_v6 = vpop.permute.xlu0 %180 }
  0x83   :  { %v101_v7 = vpop.permute.xlu1 %100 }
  0x86   :  { %v1558_v8 = vpop.permute.xlu0 %185 }
  0x87   :  { %v106_v9 = vpop.permute.xlu1 %105 }
  0x8a   :  { %v1563_v11 = vpop.permute.xlu0 %190 }
  0x8b   :  { %v1565_v12 = vpop.permute.xlu1 %195 }
  0x8e   :  { %v111_v13 = vpop.permute.xlu0 %110 }
  0x8f   :  { %v116_v14 = vpop.permute.xlu1 %115 }
  0x92   :  { %v1567_v15 = vpop.permute.xlu0 %200 }
  0x93   :  { %v1569_v16 = vpop.permute.xlu1 %205 }
  0x96   :  { %v121_v17 = vpop.permute.xlu0 %120 }
  0x97   :  { %v126_v18 = vpop.permute.xlu1 %125 }
  0x9a   :  { %v1571_v19 = vpop.permute.xlu0 %210 }
  0x9b   :  { %v1573_v20 = vpop.permute.xlu1 %215 }
  0x9e   :  { %v131_v21 = vpop.permute.xlu0 %130 }
  0x9f   :  { %v136_v22 = vpop.permute.xlu1 %135 }
  0xa2   :  { %v1575_v23 = vpop.permute.xlu0 %220 }
  0xa3   :  { %v1577_v24 = vpop.permute.xlu1 %225 }
  0xa6   :  { %v141_v25 = vpop.permute.xlu0 %140 }
  0xa7   :  { %v146_v26 = vpop.permute.xlu1 %145 }
  0xaa   :  { %v1579_v27 = vpop.permute.xlu0 %230 }
  0xab   :  { %v1581_v28 = vpop.permute.xlu1 %235 }
  0xae   :  { %v151_v29 = vpop.permute.xlu0 %150 }
  0xaf   :  { %v156_v33 = vpop.permute.xlu1 %155 }
  0xb2   :  { %v1583_v41 = vpop.permute.xlu0 %240 }
  0xb3   :  { %v1587_v45 = vpop.permute.xlu1 %245 }
  0xb6   :  { %v161_v54 = vpop.permute.xlu0 %160 }
  0xb7   :  { %v166_v58 = vpop.permute.xlu1 %165 }
  0xba   :  { %v1595_v2 = vpop.permute.xlu0 %250 }
  0xe1   :  { %v1164_v30 = vpop.f32.mrb[0].mxu0 }
  0xe2   :  { %v451_v31 = vadd.f32 %v1164_v30, %v111_v13  ;;  %v442_v32 = vpop.f32.mrb[1].mxu0 }
  0xe3   :  { %v443_v34 = vadd.f32 %v442_v32, %v101_v7  ;;  %v1165_v35 = vpop.f32.mrb[2].mxu0 }
  0xe4   :  { %v454_v36 = vadd.f32 %v1165_v35, %v116_v14  ;;  %v445_v37 = vpop.f32.mrb[3].mxu0  ;;  %v571_v39 = vmax.f32 %v451_v31, 0.0 }
  0xe5   :  { %v446_v38 = vadd.f32 %v445_v37, %v106_v9  ;;  %v569_v42 = vmax.f32 %v443_v34, 0.0  ;;  %v1597_v9 = vpop.permute.xlu1 %255 }
  0xe6   :  { %v572_v40 = vmax.f32 %v454_v36, 0.0 }
  0xe7   :  { %v570_v43 = vmax.f32 %v446_v38, 0.0 }
  0xe8   :  { %v1585_v44 = vpack.c.bf16 %v572_v40, %v571_v39 }
  0xe9   :  { %v1168_v46 = vpop.f32.mrb[4].mxu0  ;;  %v1589_v47 = vpack.c.bf16 %v570_v43, %v569_v42  ;;  %v176_v34 = vpop.permute.xlu1 %175 }
  0xea   :  { %v467_v48 = vadd.f32 %v1168_v46, %v131_v21  ;;  %v458_v49 = vpop.f32.mrb[5].mxu0 }
  0xeb   :  { %v459_v50 = vadd.f32 %v458_v49, %v121_v17  ;;  %v1169_v51 = vpop.f32.mrb[6].mxu0 }
  0xec   :  { %v470_v52 = vadd.f32 %v1169_v51, %v136_v22  ;;  %v461_v53 = vpop.f32.mrb[7].mxu0  ;;  %v575_v56 = vmax.f32 %v467_v48, 0.0  ;;  %v171_v22 = vpop.permute.xlu0 %170 }
  0xed   :  { %v462_v55 = vadd.f32 %v461_v53, %v126_v18  ;;  %v573_v59 = vmax.f32 %v459_v50, 0.0 }
  0xee   :  { %v576_v57 = vmax.f32 %v470_v52, 0.0 }
  0xef   :  { %v574_v60 = vmax.f32 %v462_v55, 0.0 }
  0xf0   :  { %v1591_v61 = vpack.c.bf16 %v576_v57, %v575_v56 }
  0xf1   :  { %v1593_v62 = vpack.c.bf16 %v574_v60, %v573_v59  ;;  %v1172_v63 = vpop.f32.mrb[8].mxu0 }
  0xf2   :  { %v483_v0 = vadd.f32 %v1172_v63, %v151_v29  ;;  %v474_v1 = vpop.f32.mrb[9].mxu0 }
  0xf3   :  { %v475_v3 = vadd.f32 %v474_v1, %v141_v25  ;;  %v1173_v4 = vpop.f32.mrb[10].mxu0 }
  0xf4   :  { %v486_v5 = vadd.f32 %v1173_v4, %v156_v33  ;;  %v477_v7 = vpop.f32.mrb[11].mxu0  ;;  %v579_v13 = vmax.f32 %v483_v0, 0.0 }
  0xf5   :  { %v478_v10 = vadd.f32 %v477_v7, %v146_v26  ;;  %v577_v17 = vmax.f32 %v475_v3, 0.0 }
  0xf6   :  { %v580_v14 = vmax.f32 %v486_v5, 0.0 }
  0xf7   :  { %v578_v18 = vmax.f32 %v478_v10, 0.0 }
  0xf8   :  { %v1599_v21 = vpack.c.bf16 %v580_v14, %v579_v13 }
  0xf9   :  { %v1601_v30 = vpack.c.bf16 %v578_v18, %v577_v17  ;;  %v1176_v29 = vpop.f32.mrb[12].mxu0 }
  0xfa   :  { %v499_v31 = vadd.f32 %v1176_v29, %v171_v22  ;;  %v490_v32 = vpop.f32.mrb[13].mxu0 }
  0xfb   :  { %v491_v25 = vadd.f32 %v490_v32, %v161_v54  ;;  %v1177_v35 = vpop.f32.mrb[14].mxu0 }
  0xfc   :  { %v502_v33 = vadd.f32 %v1177_v35, %v176_v34  ;;  %v493_v36 = vpop.f32.mrb[15].mxu0  ;;  %v583_v38 = vmax.f32 %v499_v31, 0.0 }
  0xfd   :  { %v494_v37 = vadd.f32 %v493_v36, %v166_v58  ;;  %v581_v39 = vmax.f32 %v491_v25, 0.0 }
  0xfe   :  { %v584_v26 = vmax.f32 %v502_v33, 0.0 }
  0xff   :  { %v582_v40 = vmax.f32 %v494_v37, 0.0 }
 0x100   :  { %v1603_v42 = vpack.c.bf16 %v584_v26, %v583_v38 }
 0x101   :  { %v1605_v43 = vpack.c.bf16 %v582_v40, %v581_v39  ;;  %v1180_v46 = vpop.f32.mrb[16].mxu0  ;;  %v1249_v40 = vld [vmem:[%s1705_s3 + $0x34] ss:$8 sps:$4 sm:$0xff]  }
 0x102   :  { %v515_v48 = vadd.f32 %v1180_v46, %v1563_v11  ;;  %v506_v49 = vpop.f32.mrb[17].mxu0  ;;  %v1254_v46 = vld [vmem:[%s1705_s3 + $0x40] ss:$8 sps:$4 sm:$0xff]  }
 0x103   :  { %v507_v50 = vadd.f32 %v506_v49, %v1556_v6  ;;  %v1181_v51 = vpop.f32.mrb[18].mxu0  ;;  %v1257_v49 = vld [vmem:[%s1705_s3 + $0x50] ss:$8 sps:$4 sm:$0xff]  }
 0x104   :  { %v518_v52 = vadd.f32 %v1181_v51, %v1565_v12  ;;  %v509_v53 = vpop.f32.mrb[19].mxu0  ;;  %v587_v55 = vmax.f32 %v515_v48, 0.0  ;;  %v1255_v48 = vld [vmem:[%s1705_s3 + $0x54] ss:$8 sps:$4 sm:$0xff]   ;;  %v1260_v51 = vld [vmem:[%s1705_s3 + $0x60] ss:$8 sps:$4 sm:$0xff]  }
 0x105   :  { %v510_v54 = vadd.f32 %v509_v53, %v1558_v8  ;;  %v585_v57 = vmax.f32 %v507_v50, 0.0  ;;  %v1258_v50 = vld [vmem:[%s1705_s3 + $0x64] ss:$8 sps:$4 sm:$0xff]   ;;  %v1263_v53 = vld [vmem:[%s1705_s3 + $0x70] ss:$8 sps:$4 sm:$0xff]  }
 0x106   :  { %v588_v56 = vmax.f32 %v518_v52, 0.0  ;;  %v1261_v52 = vld [vmem:[%s1705_s3 + $0x74] ss:$8 sps:$4 sm:$0xff]  }
 0x107   :  { %v586_v58 = vmax.f32 %v510_v54, 0.0  ;;  %v1293_v54 = vmov 0.0  }
 0x108   :  { %v626_v59 = vpack.c.bf16 %v588_v56, %v587_v55  ;;  %1194 = vmatprep.subr.bf16.mxu0 %v1293_v54  ;;  %1210 = vmatprep.mubr.msk.bf16.mxu0 %vm1294_vm2, %v1293_v54 }
 0x109   :  { %v1184_v60 = vpop.f32.mrb[20].mxu0  ;;  %v625_v63 = vpack.c.bf16 %v586_v58, %v585_v57 }
 0x10a   :  { %v531_v0 = vadd.f32 %v1184_v60, %v1571_v19  ;;  %v522_v1 = vpop.f32.mrb[21].mxu0 }
 0x10b   :  { %v523_v11 = vadd.f32 %v522_v1, %v1567_v15  ;;  %v1185_v3 = vpop.f32.mrb[22].mxu0  ;;  %1083 = vmatprep.subr.bf16.mxu1 %v625_v63  ;;  %v657_v1 = vpop.permute.xlu1 %656 }
 0x10c   :  { %v534_v6 = vadd.f32 %v1185_v3, %v1573_v20  ;;  %v525_v12 = vpop.f32.mrb[23].mxu0  ;;  %1084 = vmatpush3.bf16.msra.mxu1 %v1589_v47  ;;  %v591_v4 = vmax.f32 %v531_v0, 0.0 }
 0x10d   :  { %v526_v8 = vadd.f32 %v525_v12, %v1569_v16  ;;  %1085 = vmatprep.subr.bf16.mxu1 %v626_v59  ;;  %v589_v7 = vmax.f32 %v523_v11, 0.0  ;;  %v652_v59 = vpop.permute.xlu0 %651 }
 0x10e   :  { %v592_v5 = vmax.f32 %v534_v6, 0.0 }
 0x10f   :  { %v590_v10 = vmax.f32 %v526_v8, 0.0 }
 0x110   :  { %v628_v13 = vpack.c.bf16 %v592_v5, %v591_v4  ;;  %1086 = vmatpush3.bf16.msra.mxu1 %v1585_v44 }
 0x111   :  { %v627_v19 = vpack.c.bf16 %v590_v10, %v589_v7  ;;  %v1188_v14 = vpop.f32.mrb[24].mxu0  ;;  %v662_v10 = vpop.permute.xlu0 %661 }
 0x112   :  { %v547_v15 = vadd.f32 %v1188_v14, %v1579_v27  ;;  %v538_v17 = vpop.f32.mrb[25].mxu0 }
 0x113   :  { %v539_v20 = vadd.f32 %v538_v17, %v1575_v23  ;;  %v1189_v18 = vpop.f32.mrb[26].mxu0  ;;  %1087 = vmatprep.subr.bf16.mxu1 %v627_v19 }
 0x114   :  { %v550_v47 = vadd.f32 %v1189_v18, %v1581_v28  ;;  %v541_v16 = vpop.f32.mrb[27].mxu0  ;;  %1088 = vmatpush3.bf16.msra.mxu1 %v1593_v62  ;;  %v595_v29 = vmax.f32 %v547_v15, 0.0  ;;  %v667_v15 = vpop.permute.xlu1 %666 }
 0x115   :  { %v542_v22 = vadd.f32 %v541_v16, %v1577_v24  ;;  %1089 = vmatprep.subr.bf16.mxu1 %v628_v13  ;;  %v593_v44 = vmax.f32 %v539_v20, 0.0 }
 0x116   :  { %v596_v31 = vmax.f32 %v550_v47, 0.0 }
 0x117   :  { %v594_v32 = vmax.f32 %v542_v22, 0.0 }
 0x118   :  { %v630_v34 = vpack.c.bf16 %v596_v31, %v595_v29  ;;  %1090 = vmatpush3.bf16.msra.mxu1 %v1591_v61 }
 0x119   :  { %v629_v27 = vpack.c.bf16 %v594_v32, %v593_v44  ;;  %v1192_v25 = vpop.f32.mrb[28].mxu0  ;;  %v672_v44 = vpop.permute.xlu0 %671 }
 0x11a   :  { %v563_v23 = vadd.f32 %v1192_v25, %v1595_v2  ;;  %v554_v35 = vpop.f32.mrb[29].mxu0  ;;  %v677_v25 = vpop.permute.xlu1 %676 }
 0x11b   :  { %v555_v28 = vadd.f32 %v554_v35, %v1583_v41  ;;  %v1193_v33 = vpop.f32.mrb[30].mxu0  ;;  %1091 = vmatprep.subr.bf16.mxu1 %v629_v27  ;;  %v1240_v41 = vld [vmem:[%s1705_s3] ss:$8 sps:$4 sm:$0xff]  }
 0x11c   :  { %v566_v62 = vadd.f32 %v1193_v33, %v1597_v9  ;;  %v557_v24 = vpop.f32.mrb[31].mxu0  ;;  %1092 = vmatpush3.bf16.msra.mxu1 %v1601_v30  ;;  %v599_v37 = vmax.f32 %v563_v23, 0.0  ;;  %v1245_v9 = vld [vmem:[%s1705_s3 + $0x10] ss:$8 sps:$4 sm:$0xff]   ;;  %v1248_v30 = vld [vmem:[%s1705_s3 + $0x20] ss:$8 sps:$4 sm:$0xff]  }
 0x11d   :  { %v558_v36 = vadd.f32 %v557_v24, %v1587_v45  ;;  %1093 = vmatprep.subr.bf16.mxu1 %v630_v34  ;;  %v597_v61 = vmax.f32 %v555_v28, 0.0  ;;  %v1243_v45 = vld [vmem:[%s1705_s3 + $0x14] ss:$8 sps:$4 sm:$0xff]  }
 0x11e   :  { %v600_v38 = vmax.f32 %v566_v62, 0.0 }
 0x11f   :  { %v598_v26 = vmax.f32 %v558_v36, 0.0 }
 0x120   :  { %v632_v39 = vpack.c.bf16 %v600_v38, %v599_v37  ;;  %1094 = vmatpush3.bf16.msra.mxu1 %v1599_v21  ;;  %v1246_v21 = vld [vmem:[%s1705_s3 + $0x24] ss:$8 sps:$4 sm:$0xff]   ;;  %v682_v38 = vpop.permute.xlu0 %681 }
 0x121   :  { %v631_v2 = vpack.c.bf16 %v598_v26, %v597_v61 }
 0x123   :  { %1095 = vmatprep.subr.bf16.mxu1 %v631_v2  ;;  %v687_v2 = vpop.permute.xlu1 %686 }
 0x124   :  { %1096 = vmatpush3.bf16.msra.mxu1 %v1605_v43  ;;  %v1252_v43 = vld [vmem:[%s1705_s3 + $0x44] ss:$8 sps:$4 sm:$0xff]  }
 0x125   :  { %1097 = vmatprep.subr.bf16.mxu1 %v632_v39 }
 0x128   :  { %1098 = vmatpush3.bf16.msra.mxu1 %v1603_v42  ;;  %v1251_v42 = vld [vmem:[%s1705_s3 + $0x30] ss:$8 sps:$4 sm:$0xff]  }
 0x12b   :  { %842 = vmatmul.mubr.bf16.vlgmr.msra.gmra.mrb[0].mxu1 %v1240_v41 }
 0x12c   :  { %849 = vmatprep.mubr.bf16.mxu1 %v1243_v45 }
 0x133   :  { %850 = vmatmul.mubr.bf16.gmra.mrb[4].mxu1 %v1245_v9 }
 0x134   :  { %857 = vmatprep.mubr.bf16.mxu1 %v1246_v21 }
 0x13b   :  { %858 = vmatmul.mubr.bf16.gmra.mrb[8].mxu1 %v1248_v30 }
 0x13c   :  { %865 = vmatprep.mubr.bf16.mxu1 %v1249_v40 }
 0x143   :  { %866 = vmatmul.mubr.bf16.gmra.mrb[12].mxu1 %v1251_v42 }
 0x144   :  { %873 = vmatprep.mubr.bf16.mxu1 %v1252_v43 }
 0x14b   :  { %874 = vmatmul.mubr.bf16.gmra.mrb[16].mxu1 %v1254_v46  ;;  %v692_v46 = vpop.permute.xlu0 %691 }
 0x14c   :  { %881 = vmatprep.mubr.bf16.mxu1 %v1255_v48 }
 0x153   :  { %882 = vmatmul.mubr.bf16.gmra.mrb[20].mxu1 %v1257_v49 }
 0x154   :  { %889 = vmatprep.mubr.bf16.mxu1 %v1258_v50 }
 0x15b   :  { %890 = vmatmul.mubr.bf16.gmra.mrb[24].mxu1 %v1260_v51  ;;  %v697_v51 = vpop.permute.xlu1 %696 }
 0x15c   :  { %897 = vmatprep.mubr.bf16.mxu1 %v1261_v52 }
 0x163   :  { %898 = vmatmul.mubr.bf16.gmra.mrb[28].mxu1 %v1263_v53 }
 0x1fe   :  { %v1099_v55 = vpop.f32.mrb[0].mxu1 }
 0x1ff   :  { %v1100_v56 = vpop.f32.mrb[1].mxu1 }
 0x200   :  { %v1101_v57 = vadd.f32 %v1100_v56, %v1099_v55  ;;  %v1102_v58 = vpop.f32.mrb[2].mxu1 }
 0x201   :  { %v1103_v60 = vpop.f32.mrb[3].mxu1 }
 0x202   :  { %v844_v63 = vadd.f32 %v1101_v57, %v652_v59  ;;  %v1104_v0 = vadd.f32 %v1103_v60, %v1102_v58 }
 0x204   :  { %v847_v11 = vadd.f32 %v1104_v0, %v657_v1  ;;  %v906_v3 = vmax.f32 %v844_v63, 0.0  ;;  %v702_v63 = vpop.permute.xlu0 %701 }
 0x206   :  { %v907_v6 = vmax.f32 %v847_v11, 0.0  ;;  %v1105_v12 = vpop.f32.mrb[4].mxu1 }
 0x207   :  { %v1106_v8 = vpop.f32.mrb[5].mxu1 }
 0x208   :  { %v923_v4 = vpack.c.bf16 %v907_v6, %v906_v3  ;;  %v1107_v5 = vadd.f32 %v1106_v8, %v1105_v12  ;;  %v1108_v7 = vpop.f32.mrb[6].mxu1  ;;  %v707_v3 = vpop.permute.xlu1 %706 }
 0x209   :  { %v1109_v13 = vpop.f32.mrb[7].mxu1 }
 0x20a   :  { %v852_v19 = vadd.f32 %v1107_v5, %v662_v10  ;;  %v1110_v14 = vadd.f32 %v1109_v13, %v1108_v7  ;;  %1195 = vmatpush3.bf16.msra.mxu0 %v923_v4 }
 0x20b   :  { %1196 = vmatprep.subr.bf16.mxu0 %v1293_v54 }
 0x20c   :  { %v855_v17 = vadd.f32 %v1110_v14, %v667_v15  ;;  %v908_v20 = vmax.f32 %v852_v19, 0.0  ;;  %v712_v19 = vpop.permute.xlu0 %711 }
 0x20e   :  { %v909_v18 = vmax.f32 %v855_v17, 0.0  ;;  %v1111_v47 = vpop.f32.mrb[8].mxu1 }
 0x20f   :  { %v1112_v16 = vpop.f32.mrb[9].mxu1 }
 0x210   :  { %v924_v22 = vpack.c.bf16 %v909_v18, %v908_v20  ;;  %v1113_v29 = vadd.f32 %v1112_v16, %v1111_v47  ;;  %v1114_v31 = vpop.f32.mrb[10].mxu1  ;;  %v717_v20 = vpop.permute.xlu1 %716 }
 0x211   :  { %v1115_v32 = vpop.f32.mrb[11].mxu1 }
 0x212   :  { %v860_v34 = vadd.f32 %v1113_v29, %v672_v44  ;;  %v1116_v27 = vadd.f32 %v1115_v32, %v1114_v31  ;;  %1197 = vmatpush3.bf16.msra.mxu0 %v924_v22 }
 0x213   :  { %1198 = vmatprep.subr.bf16.mxu0 %v1293_v54 }
 0x214   :  { %v863_v23 = vadd.f32 %v1116_v27, %v677_v25  ;;  %v910_v35 = vmax.f32 %v860_v34, 0.0  ;;  %v722_v34 = vpop.permute.xlu0 %721 }
 0x216   :  { %v911_v28 = vmax.f32 %v863_v23, 0.0  ;;  %v1117_v33 = vpop.f32.mrb[12].mxu1 }
 0x217   :  { %v1118_v62 = vpop.f32.mrb[13].mxu1 }
 0x218   :  { %v925_v24 = vpack.c.bf16 %v911_v28, %v910_v35  ;;  %v1119_v36 = vadd.f32 %v1118_v62, %v1117_v33  ;;  %v1120_v37 = vpop.f32.mrb[14].mxu1  ;;  %v727_v35 = vpop.permute.xlu1 %726 }
 0x219   :  { %v1121_v61 = vpop.f32.mrb[15].mxu1 }
 0x21a   :  { %v868_v26 = vadd.f32 %v1119_v36, %v682_v38  ;;  %v1122_v39 = vadd.f32 %v1121_v61, %v1120_v37  ;;  %1199 = vmatpush3.bf16.msra.mxu0 %v925_v24  ;;  %v922_v36 = vld [vmem:[%s1707_s5] sm:$0x3]  ;;  %v935_v37 = vpop.permute.xlu0 %934  ;;  %s1295_s5 = smov [#allocation2]  }
 0x21b   :  { %1200 = vmatprep.subr.bf16.mxu0 %v1293_v54  ;;  %s1005_s17 = sshll.u32 %s1295_s5, 4  ;;  %s1006_s17 = int_to_ptr.vmem [resolvable:$true] %s1005_s17 }
 0x21c   :  { %v871_v41 = vadd.f32 %v1122_v39, %v687_v2  ;;  %v912_v45 = vmax.f32 %v868_v26, 0.0  ;;  %s1268_s1 = scalar_lea.vmem %s1006_s17, 64  ;;  %p1273_p1 = scmp.lt.s32.totalorder %s1006_s17, %s1006_s17 }
 0x21d   :  { %p1269_p0 = scmp.ne.s32.totalorder %s1006_s17, %s1268_s1  ;;  %p1274_p2 = scmp.lt.s32.totalorder %s1268_s1, %s1268_s1 }
 0x21e   :  { %v913_v9 = vmax.f32 %v871_v41, 0.0  ;;  %v1123_v21 = vpop.f32.mrb[16].mxu1 }
 0x21f   :  { %v1124_v30 = vpop.f32.mrb[17].mxu1  ;;  %p1275_p3 = por %p1274_p2, %p1273_p1 }
 0x220   :  { %v926_v40 = vpack.c.bf16 %v913_v9, %v912_v45  ;;  %v1125_v42 = vadd.f32 %v1124_v30, %v1123_v21  ;;  %v1126_v43 = vpop.f32.mrb[18].mxu1 }
 0x221   :  { %v1127_v48 = vpop.f32.mrb[19].mxu1  ;;  %p1276_p4 = pnand %p1275_p3, %p1269_p0 }
 0x222   :  { %v876_v49 = vadd.f32 %v1125_v42, %v692_v46  ;;  %v1128_v50 = vadd.f32 %v1127_v48, %v1126_v43  ;;  %1201 = vmatpush3.bf16.msra.mxu0 %v926_v40 }
 0x223   :  { %1202 = vmatprep.subr.bf16.mxu0 %v1293_v54 }
 0x224   :  { %v879_v52 = vadd.f32 %v1128_v50, %v697_v51  ;;  %v914_v53 = vmax.f32 %v876_v49, 0.0 }
 0x226   :  { %v915_v55 = vmax.f32 %v879_v52, 0.0  ;;  %v1129_v56 = vpop.f32.mrb[20].mxu1 }
 0x227   :  { %v1130_v57 = vpop.f32.mrb[21].mxu1 }
 0x228   :  { %v927_v58 = vpack.c.bf16 %v915_v55, %v914_v53  ;;  %v1131_v59 = vadd.f32 %v1130_v57, %v1129_v56  ;;  %v1132_v60 = vpop.f32.mrb[22].mxu1 }
 0x229   :  { %v1133_v0 = vpop.f32.mrb[23].mxu1 }
 0x22a   :  { %v884_v1 = vadd.f32 %v1131_v59, %v702_v63  ;;  %v1134_v11 = vadd.f32 %v1133_v0, %v1132_v60  ;;  %1203 = vmatpush3.bf16.msra.mxu0 %v927_v58 }
 0x22b   :  { %1204 = vmatprep.subr.bf16.mxu0 %v1293_v54 }
 0x22c   :  { %v887_v6 = vadd.f32 %v1134_v11, %v707_v3  ;;  %v916_v12 = vmax.f32 %v884_v1, 0.0 }
 0x22e   :  { %v917_v8 = vmax.f32 %v887_v6, 0.0  ;;  %v1135_v4 = vpop.f32.mrb[24].mxu1 }
 0x22f   :  { %v1136_v5 = vpop.f32.mrb[25].mxu1 }
 0x230   :  { %v928_v7 = vpack.c.bf16 %v917_v8, %v916_v12  ;;  %v1137_v10 = vadd.f32 %v1136_v5, %v1135_v4  ;;  %v1138_v13 = vpop.f32.mrb[26].mxu1 }
 0x231   :  { %v1139_v14 = vpop.f32.mrb[27].mxu1 }
 0x232   :  { %v892_v15 = vadd.f32 %v1137_v10, %v712_v19  ;;  %v1140_v17 = vadd.f32 %v1139_v14, %v1138_v13  ;;  %1205 = vmatpush3.bf16.msra.mxu0 %v928_v7 }
 0x233   :  { %1206 = vmatprep.subr.bf16.mxu0 %v1293_v54 }
 0x234   :  { %v895_v18 = vadd.f32 %v1140_v17, %v717_v20  ;;  %v918_v47 = vmax.f32 %v892_v15, 0.0 }
 0x236   :  { %v919_v16 = vmax.f32 %v895_v18, 0.0  ;;  %v1141_v22 = vpop.f32.mrb[28].mxu1 }
 0x237   :  { %v1142_v29 = vpop.f32.mrb[29].mxu1 }
 0x238   :  { %v929_v31 = vpack.c.bf16 %v919_v16, %v918_v47  ;;  %v1143_v44 = vadd.f32 %v1142_v29, %v1141_v22  ;;  %v1144_v32 = vpop.f32.mrb[30].mxu1 }
 0x239   :  { %v1145_v27 = vpop.f32.mrb[31].mxu1 }
 0x23a   :  { %v900_v25 = vadd.f32 %v1143_v44, %v722_v34  ;;  %v1146_v23 = vadd.f32 %v1145_v27, %v1144_v32  ;;  %1207 = vmatpush3.bf16.msra.mxu0 %v929_v31 }
 0x23b   :  { %1208 = vmatprep.subr.bf16.mxu0 %v1293_v54 }
 0x23c   :  { %v903_v28 = vadd.f32 %v1146_v23, %v727_v35  ;;  %v920_v33 = vmax.f32 %v900_v25, 0.0 }
 0x23e   :  { %v921_v62 = vmax.f32 %v903_v28, 0.0 }
 0x240   :  { %v930_v24 = vpack.c.bf16 %v921_v62, %v920_v33 }
 0x242   :  { %1209 = vmatpush3.bf16.msra.mxu0 %v930_v24 }
 0x245   :  { %1211 = vmatmul.mubr.bf16.vlgmr.msra.gmra.mrb[32].mxu0 %v922_v36 }
 0x318   :  { %v971_v38 = vpop.f32.mrb[32].mxu0 }
 0x319   :  { %v972_v61 = vadd.f32 %v971_v38, %v935_v37  ;;  %v1212_v26 = vpop.f32.mrb[33].mxu0 }
 0x31a   :  { %v974_v39 = vpop.f32.mrb[34].mxu0 }
 0x31b   :  { %v978_v2 = vsel %vm977_vm3, %v972_v61, -inf  ;;  %v1213_v41 = vpop.f32.mrb[35].mxu0 }
 0x31c   :  { %v979_v54 = vrot.slane %v978_v2, 4 }
 0x31e   :  { %v980_v45 = vmax.f32 %v978_v2, %v979_v54 }
 0x320   :  { %v981_v9 = vrot.slane %v980_v45, 2 }
 0x322   :  { %v982_v21 = vmax.f32 %v980_v45, %v981_v9 }
 0x324   :  { %v983_v30 = vrot.slane %v982_v21, 1 }
 0x326   :  { %v984_v40 = vmax.f32 %v982_v21, %v983_v30 }
 0x328   :  { %v985_v42 = vsub.f32 %v972_v61, %v984_v40 }
 0x32a   :  { %v986_v43 = vmul.f32 1.442695, %v985_v42 }
 0x32c   :  { %1264 = vpow2.f32 %v986_v43 }
 0x336   :  { %v1265_v46 = vpop.eup %1264 }
 0x337   :  { %v988_v48 = vsel %vm977_vm3, %v1265_v46, 0.0 }
 0x338   :  { %v989_v49 = vrot.slane %v988_v48, 4 }
 0x33a   :  { %v990_v50 = vadd.f32 %v989_v49, %v988_v48 }
 0x33c   :  { %v991_v51 = vrot.slane %v990_v50, 2 }
 0x33e   :  { %v992_v52 = vadd.f32 %v991_v51, %v990_v50 }
 0x340   :  { %v993_v53 = vrot.slane %v992_v52, 1 }
 0x342   :  { %v994_v55 = vadd.f32 %v993_v53, %v992_v52 }
 0x344   :  { %1266 = vlog2.f32 %v994_v55 }
 0x34e   :  { %v1267_v56 = vpop.eup %1266 }
 0x34f   :  { %v996_v57 = vmul.f32 0.6931472, %v1267_v56 }
 0x351   :  { %v997_v58 = vsub.f32 %v985_v42, %v996_v57 }
 0x353   :  { %998 = vst [vmem:[#allocation2] sm:$0x7] %v997_v58 }
 0x354   :  { %1279 = shalt.err (!%p1276_p4)
}
 0x355   :  { %s1280_s19 = scalar_lea.hbm %s1709_s7, 64 }
 0x356   :  { %p1281_p5 = scmp.ne.s32.totalorder %s1709_s7, %s1280_s19  ;;  %p1284_p6 = scmp.lt.u32.totalorder %s1280_s19, %s1709_s7 }
 0x358   :  { %p1286_p7 = pnand %p1284_p6, %p1281_p5 }
 0x35a   :  { %1289 = shalt.err (!%p1286_p7)
}
 0x35b   :  { %1008 = dma.vmem_to_hbm [thread:$0]  %s1006_s17, 64, %s1709_s7, [#allocation3]  }
 0x35c   :  { %1290 = dma.done.wait [#allocation3], 64  }
 0x35d   :  { %1291 = vsyncadd [#allocation3], 4294967232 }
 0x35e   :  { %1012 = vsyncpa [#allocation3], 1 }

</bundles_post_ra>
